<compile_context>
chip_gen: v7x
topology: tpu7x:2x2x1
jax: 0.10.0
libtpu: 0.0.40
codegen_flags: <defaults>
</compile_context>

<pallas_src>
import functools

import jax
import jax.numpy as jnp
from jax.experimental import pallas as pl
from jax.experimental.pallas import tpu as pltpu

LANE = 128
SUBLANE = 8


def _round_up(x, m):
    return ((x + m - 1) // m) * m


def _iou_kernel(p_ref, t_ref, out_ref, acc_ref, *, n_valid, tile_rows,
                blocks_per_core):
    c = pl.program_id(0)          # core (parallel) axis
    j = pl.program_id(1)          # row-block (reduction) axis

    @pl.when(j == 0)
    def _():
        acc_ref[...] = jnp.zeros_like(acc_ref)

    x = p_ref[...].astype(jnp.float32)
    t = t_ref[...].astype(jnp.float32)
    p = jax.nn.sigmoid(x)

    # Mask out-of-range elements: the ragged last block (Pallas boundary
    # padding is undefined data), lane-level padding, and fully-out-of-range
    # "overflow" steps whose index_map was clamped.
    logical_block = c * blocks_per_core + j
    base = logical_block * (tile_rows * LANE)
    row_ids = jax.lax.broadcasted_iota(jnp.int32, (tile_rows, LANE), 0)
    lane_ids = jax.lax.broadcasted_iota(jnp.int32, (tile_rows, LANE), 1)
    flat_idx = base + row_ids * LANE + lane_ids
    valid = flat_idx < n_valid
    p = jnp.where(valid, p, 0.0)
    t = jnp.where(valid, t, 0.0)

    # Per-vreg partial sums: (tile_rows, 128) -> (8, 128) via vector adds only;
    # the expensive cross-lane reduce is deferred to the wrapper epilogue.
    groups = tile_rows // SUBLANE
    pt = (p * t).reshape(groups, SUBLANE, LANE)
    ps = (p + t).reshape(groups, SUBLANE, LANE)
    acc_ref[0] += jnp.sum(pt, axis=0)
    acc_ref[1] += jnp.sum(ps, axis=0)

    @pl.when(j == pl.num_programs(1) - 1)
    def _():
        out_ref[0] = acc_ref[...]


def iou_loss(preds, targets, *, smooth=1e-6, tile_rows=2048):
    """Pallas implementation of IoULoss.forward(preds, targets)."""
    n = preds.size
    assert targets.size == n

    p_flat = preds.reshape(-1)
    t_flat = targets.reshape(-1)

    pad = (-n) % LANE
    if pad:
        # TODO(synk): sizes not a multiple of 128 fall back to a padding copy;
        # a fully copy-free ragged tail would need 1-D blocks / manual DMA.
        p_flat = jnp.pad(p_flat, (0, pad))
        t_flat = jnp.pad(t_flat, (0, pad))
    rows = (n + pad) // LANE

    # Tile size: large, multiple of 8 sublanes, capped for small inputs.
    tr = min(tile_rows, _round_up(rows, SUBLANE))
    tr = max(SUBLANE, (tr // SUBLANE) * SUBLANE)

    total_blocks = pl.cdiv(rows, tr)
    blocks_per_core = pl.cdiv(total_blocks, 2)   # 2-way split for v7x megacore

    p2 = p_flat.reshape(rows, LANE)
    t2 = t_flat.reshape(rows, LANE)

    def in_map(c, j):
        # Clamp so overflow steps (odd block count / tiny inputs) re-read an
        # in-bounds block; their contribution is zeroed by the in-kernel mask.
        return (jnp.minimum(c * blocks_per_core + j, total_blocks - 1), 0)

    partials = pl.pallas_call(
        functools.partial(_iou_kernel, n_valid=n, tile_rows=tr,
                          blocks_per_core=blocks_per_core),
        out_shape=jax.ShapeDtypeStruct((2, 2, SUBLANE, LANE), jnp.float32),
        grid_spec=pltpu.PrefetchScalarGridSpec(
            num_scalar_prefetch=0,
            grid=(2, blocks_per_core),
            in_specs=[
                pl.BlockSpec((tr, LANE), in_map),
                pl.BlockSpec((tr, LANE), in_map),
            ],
            out_specs=pl.BlockSpec((1, 2, SUBLANE, LANE),
                                   lambda c, j: (c, 0, 0, 0)),
            scratch_shapes=[pltpu.VMEM((2, SUBLANE, LANE), jnp.float32)],
        ),
        compiler_params=pltpu.CompilerParams(
            dimension_semantics=("parallel", "arbitrary"),
        ),
    )(p2, t2)

    intersection = jnp.sum(partials[:, 0])
    total = jnp.sum(partials[:, 1])
    union = total - intersection
    iou = (intersection + smooth) / (union + smooth)
    return 1.0 - iou


def _iou_loss_ref(preds, targets, smooth=1e-6):
    p = jax.nn.sigmoid(preds.astype(jnp.float32)).reshape(-1)
    t = targets.astype(jnp.float32).reshape(-1)
    inter = jnp.sum(p * t)
    total = jnp.sum(p + t)
    union = total - inter
    return 1.0 - (inter + smooth) / (union + smooth)


if __name__ == "__main__":
    key = jax.random.PRNGKey(0)
    k1, k2 = jax.random.split(key)
    # Small shapes consistent with a segmentation-style input: NCHW.
    preds = jax.random.normal(k1, (2, 4, 16, 16), dtype=jnp.float32)
    targets = (jax.random.uniform(k2, (2, 4, 16, 16)) > 0.5).astype(jnp.float32)

    loss = jax.block_until_ready(iou_loss(preds, targets))
    ref = jax.block_until_ready(_iou_loss_ref(preds, targets))

    assert jnp.allclose(loss, ref, rtol=1e-5, atol=1e-6), (loss, ref)
    print("KERNEL_OK")
</pallas_src>

<mosaic_0001>
module attributes {stable_mosaic.version = 11 : i64} {
  func.func @_iou_kernel(%arg0: i32, %arg1: i32, %arg2: memref<16x128xf32, #tpu.memory_space<vmem>>, %arg3: memref<16x128xf32, #tpu.memory_space<vmem>>, %arg4: memref<1x2x8x128xf32, #tpu.memory_space<vmem>>, %arg5: memref<2x8x128xf32, #tpu.memory_space<vmem>>) attributes {dimension_semantics = [#tpu.dimension_semantics<parallel>, #tpu.dimension_semantics<arbitrary>], iteration_bounds = array<i64: 2, 1>, scalar_prefetch = 0 : i64, scratch_operands = 1 : i64, tpu.core_type = #tpu.core_type<tc>, window_params = [{transform_indices = @transform_0, window_bounds = array<i64: 16, 128>}, {transform_indices = @transform_1, window_bounds = array<i64: 16, 128>}, {transform_indices = @transform_2, window_bounds = array<i64: 1, 2, 8, 128>}]} {
    %c0_i32 = arith.constant 0 : i32
    %0 = arith.cmpi eq, %arg1, %c0_i32 : i32
    %1 = arith.extui %0 : i1 to i32
    %c0_i32_0 = arith.constant 0 : i32
    %2 = arith.cmpi ne, %1, %c0_i32_0 : i32
    scf.if %2 {
      %cst_22 = arith.constant 0.000000e+00 : f32
      %47 = vector.broadcast %cst_22 : f32 to vector<2x8x128xf32>
      %c0_23 = arith.constant 0 : index
      %c0_24 = arith.constant 0 : index
      %c0_25 = arith.constant 0 : index
      %48 = vector.load %arg5[%c0_23, %c0_24, %c0_25] : memref<2x8x128xf32, #tpu.memory_space<vmem>>, vector<2x8x128xf32>
      tpu.vector_store %arg5[%c0_23, %c0_24, %c0_25], %47 {strides = array<i32>} : memref<2x8x128xf32, #tpu.memory_space<vmem>>, vector<2x8x128xf32>,
    } else {
    }
    %c0 = arith.constant 0 : index
    %c0_1 = arith.constant 0 : index
    %3 = vector.load %arg2[%c0, %c0_1] : memref<16x128xf32, #tpu.memory_space<vmem>>, vector<16x128xf32>
    %c0_2 = arith.constant 0 : index
    %c0_3 = arith.constant 0 : index
    %4 = vector.load %arg3[%c0_2, %c0_3] : memref<16x128xf32, #tpu.memory_space<vmem>>, vector<16x128xf32>
    %5 = arith.negf %3 : vector<16x128xf32>
    %6 = math.exp %5 : vector<16x128xf32>
    %cst = arith.constant 1.000000e+00 : f32
    %7 = vector.broadcast %cst : f32 to vector<16x128xf32>
    %8 = arith.addf %7, %6 : vector<16x128xf32>
    %9 = arith.divf %7, %8 : vector<16x128xf32>
    %c1_i32 = arith.constant 1 : i32
    %10 = arith.muli %arg0, %c1_i32 : i32
    %11 = arith.addi %10, %arg1 : i32
    %c2048_i32 = arith.constant 2048 : i32
    %12 = arith.muli %11, %c2048_i32 : i32
    %13 = tpu.iota {dimensions = array<i32: 0>} : vector<16x128xi32>
    %14 = tpu.iota {dimensions = array<i32: 1>} : vector<16x128xi32>
    %c128_i32 = arith.constant 128 : i32
    %15 = vector.broadcast %c128_i32 : i32 to vector<16x128xi32>
    %16 = arith.muli %13, %15 : vector<16x128xi32>
    %17 = vector.broadcast %12 : i32 to vector<16x128xi32>
    %18 = arith.addi %17, %16 : vector<16x128xi32>
    %19 = arith.addi %18, %14 : vector<16x128xi32>
    %c2048_i32_4 = arith.constant 2048 : i32
    %20 = vector.broadcast %c2048_i32_4 : i32 to vector<16x128xi32>
    %21 = arith.cmpi slt, %19, %20 : vector<16x128xi32>
    %cst_5 = arith.constant 0.000000e+00 : f32
    %22 = vector.broadcast %cst_5 : f32 to vector<16x128xf32>
    %23 = arith.select %21, %9, %22 : vector<16x128xi1>, vector<16x128xf32>
    %cst_6 = arith.constant 0.000000e+00 : f32
    %24 = vector.broadcast %cst_6 : f32 to vector<16x128xf32>
    %25 = arith.select %21, %4, %24 : vector<16x128xi1>, vector<16x128xf32>
    %26 = arith.mulf %23, %25 : vector<16x128xf32>
    %27 = vector.shape_cast %26 : vector<16x128xf32> to vector<2x8x128xf32>
    %28 = arith.addf %23, %25 : vector<16x128xf32>
    %29 = vector.shape_cast %28 : vector<16x128xf32> to vector<2x8x128xf32>
    %c0_7 = arith.constant 0 : index
    %c0_8 = arith.constant 0 : index
    %c0_9 = arith.constant 0 : index
    %30 = vector.load %arg5[%c0_7, %c0_8, %c0_9] : memref<2x8x128xf32, #tpu.memory_space<vmem>>, vector<1x8x128xf32>
    %31 = vector.shape_cast %30 : vector<1x8x128xf32> to vector<8x128xf32>
    %cst_10 = arith.constant dense<0.000000e+00> : vector<8x128xf32>
    %32 = vector.multi_reduction <add>, %27, %cst_10 [0] : vector<2x8x128xf32> to vector<8x128xf32>
    %33 = arith.addf %31, %32 : vector<8x128xf32>
    %c0_11 = arith.constant 0 : index
    %c0_12 = arith.constant 0 : index
    %c0_13 = arith.constant 0 : index
    %34 = vector.load %arg5[%c0_11, %c0_12, %c0_13] : memref<2x8x128xf32, #tpu.memory_space<vmem>>, vector<1x8x128xf32>
    %35 = vector.shape_cast %34 : vector<1x8x128xf32> to vector<8x128xf32>
    %36 = vector.shape_cast %33 : vector<8x128xf32> to vector<1x8x128xf32>
    tpu.vector_store %arg5[%c0_11, %c0_12, %c0_13], %36 {strides = array<i32>} : memref<2x8x128xf32, #tpu.memory_space<vmem>>, vector<1x8x128xf32>,
    %c1 = arith.constant 1 : index
    %c0_14 = arith.constant 0 : index
    %c0_15 = arith.constant 0 : index
    %37 = vector.load %arg5[%c1, %c0_14, %c0_15] : memref<2x8x128xf32, #tpu.memory_space<vmem>>, vector<1x8x128xf32>
    %38 = vector.shape_cast %37 : vector<1x8x128xf32> to vector<8x128xf32>
    %cst_16 = arith.constant dense<0.000000e+00> : vector<8x128xf32>
    %39 = vector.multi_reduction <add>, %29, %cst_16 [0] : vector<2x8x128xf32> to vector<8x128xf32>
    %40 = arith.addf %38, %39 : vector<8x128xf32>
    %c1_17 = arith.constant 1 : index
    %c0_18 = arith.constant 0 : index
    %c0_19 = arith.constant 0 : index
    %41 = vector.load %arg5[%c1_17, %c0_18, %c0_19] : memref<2x8x128xf32, #tpu.memory_space<vmem>>, vector<1x8x128xf32>
    %42 = vector.shape_cast %41 : vector<1x8x128xf32> to vector<8x128xf32>
    %43 = vector.shape_cast %40 : vector<8x128xf32> to vector<1x8x128xf32>
    tpu.vector_store %arg5[%c1_17, %c0_18, %c0_19], %43 {strides = array<i32>} : memref<2x8x128xf32, #tpu.memory_space<vmem>>, vector<1x8x128xf32>,
    %c0_i32_20 = arith.constant 0 : i32
    %44 = arith.cmpi eq, %arg1, %c0_i32_20 : i32
    %45 = arith.extui %44 : i1 to i32
    %c0_i32_21 = arith.constant 0 : i32
    %46 = arith.cmpi ne, %45, %c0_i32_21 : i32
    scf.if %46 {
      %c0_22 = arith.constant 0 : index
      %c0_23 = arith.constant 0 : index
      %c0_24 = arith.constant 0 : index
      %47 = vector.load %arg5[%c0_22, %c0_23, %c0_24] : memref<2x8x128xf32, #tpu.memory_space<vmem>>, vector<2x8x128xf32>
      %c0_25 = arith.constant 0 : index
      %c0_26 = arith.constant 0 : index
      %c0_27 = arith.constant 0 : index
      %c0_28 = arith.constant 0 : index
      %48 = vector.load %arg4[%c0_25, %c0_26, %c0_27, %c0_28] : memref<1x2x8x128xf32, #tpu.memory_space<vmem>>, vector<1x2x8x128xf32>
      %49 = vector.shape_cast %48 : vector<1x2x8x128xf32> to vector<2x8x128xf32>
      %50 = vector.shape_cast %47 : vector<2x8x128xf32> to vector<1x2x8x128xf32>
      tpu.vector_store %arg4[%c0_25, %c0_26, %c0_27, %c0_28], %50 {strides = array<i32>} : memref<1x2x8x128xf32, #tpu.memory_space<vmem>>, vector<1x2x8x128xf32>,
    } else {
    }
    return
  }
  func.func @transform_0(%arg0: i32, %arg1: i32) -> (i32, i32) {
    %c1_i32 = arith.constant 1 : i32
    %0 = arith.muli %arg0, %c1_i32 : i32
    %1 = arith.addi %0, %arg1 : i32
    %c0_i32 = arith.constant 0 : i32
    %2 = arith.minsi %1, %c0_i32 : i32
    %c0_i32_0 = arith.constant 0 : i32
    %c0_i32_1 = arith.constant 0 : i32
    return %2, %c0_i32_0 : i32, i32
  }
  func.func @transform_1(%arg0: i32, %arg1: i32) -> (i32, i32) {
    %c1_i32 = arith.constant 1 : i32
    %0 = arith.muli %arg0, %c1_i32 : i32
    %1 = arith.addi %0, %arg1 : i32
    %c0_i32 = arith.constant 0 : i32
    %2 = arith.minsi %1, %c0_i32 : i32
    %c0_i32_0 = arith.constant 0 : i32
    %c0_i32_1 = arith.constant 0 : i32
    return %2, %c0_i32_0 : i32, i32
  }
  func.func @transform_2(%arg0: i32, %arg1: i32) -> (i32, i32, i32, i32) {
    %c0_i32 = arith.constant 0 : i32
    %c0_i32_0 = arith.constant 0 : i32
    %c0_i32_1 = arith.constant 0 : i32
    %c0_i32_2 = arith.constant 0 : i32
    return %arg0, %c0_i32, %c0_i32_0, %c0_i32_1 : i32, i32, i32, i32
  }
}

</mosaic_0001>

<bundles_post_ra>
// kernel: tpu_custom_call.1
= control target key start
LH: loop header
LB: loop body
LE: loop exit
PB: predicated region body
PF: predicated region fallthrough
CT: control target
= control target key end

     0   :  { %7 = vsyncpa [#allocation4], 0  ;;  %s950_s0 = inlined_call_operand.hbm [shape: f32[16,128], index: 0, kind: input, shape index: {}]   ;;  %s951_s1 = inlined_call_operand.hbm [shape: f32[16,128], index: 1, kind: input, shape index: {}]   ;;  %s952_s2 = inlined_call_operand.hbm [shape: f32[2,2,8,128], index: 2, kind: output, shape index: {}]  }
   0x1   :  { %9 = vsyncpa [#allocation4 + $0x1], 0 }
   0x2   :  { %10 = vsyncpa [#allocation7], 0 }
   0x3   :  { %12 = vsyncpa [#allocation7 + $0x1], 0 }
   0x4   :  { %13 = vsyncpa [#allocation5], 0 }
   0x5   :  { %15 = vsyncpa [#allocation5 + $0x1], 0  ;;  %s739_s9 = smov 0   ;;  %s741_s10 = smov 0  }
   0x6   :  { %s743_s11 = smov 0   ;;  %s745_s12 = smov 0  }
   0x7   :  { %s747_s13 = smov 0   ;;  %s749_s14 = smov 0  }
   0x8   :  { %s751_s15 = smov 0   ;;  %s753_s16 = smov 0  }
   0x9 LB: > { %s420_s17 = sadd.s32 4294967295, %s715_s16   ;;  %s421_s18 = sadd.s32 4294967294, %s715_s16   ;;  %s715_s16 = sphi %s753_s16, %s21_s16   ;;  %s711_s15 = sphi %s751_s15, %s971_s15   ;;  %s707_s14 = sphi %s749_s14, %s970_s14   ;;  %s703_s13 = sphi %s747_s13, %s940_s13   ;;  %s699_s12 = sphi %s745_s12, %s969_s12   ;;  %s695_s11 = sphi %s743_s11, %s968_s11   ;;  %s691_s10 = sphi %s741_s10, %s967_s10   ;;  %s687_s9 = sphi %s739_s9, %s966_s9  }
   0xa   : > { %s33_s19 = sadd.s32 1, %s711_s15  ;;  %p684_p1 = scmp.ne.s32.totalorder %s703_s13, 0 }
   0xb   : > { %p35_p0 = scmp.ge.s32.totalorder %s33_s19, 2  ;;  %p54_p2 = scmp.eq.s32.totalorder %s715_s16, 0 }
   0xc   : > { %p59_p3 = scmp.ne.s32.totalorder %s703_s13, %s699_s12  ;;  %p60_p5 = scmp.eq.s32.totalorder %s420_s17, 0 }
   0xd   : > { %s973_s19 = smov (%p35_p0, %s33_s19), 0  ;;  %p785_p4 = por %p684_p1, %p54_p2 }
   0xe   : > { %p789_p6 = por %p60_p5, %p59_p3  ;;  %s101_s22 = ssub.s32 %s711_s15, %s973_s19 }
   0xf   : > { %p102_p7 = scmp.eq.s32.totalorder %s101_s22, 0  ;;  %s104_s23 = sadd.s32 1, %s695_s11 }
  0x10   : > { %s956_s21 = scalar_select %p789_p6, 1, 0 }
  0x11   : > { %s797_s24 = scalar_select %p102_p7, %s695_s11, %s104_s23  }
  0x12   : > { %p114_p8 = scmp.ne.s32.totalorder %s695_s11, %s691_s10  ;;  %p115_p9 = scmp.eq.s32.totalorder %s420_s17, 1 }
  0x13   : > { %p120_p10 = scmp.ne.s32.totalorder %s691_s10, %s687_s9  ;;  %p121_p11 = scmp.eq.s32.totalorder %s421_s18, 1 }
  0x14   : > { %p803_p12 = por %p115_p9, %p114_p8  ;;  %p462_p1 = scmp.lt.s32.totalorder %s715_s16, 2 }
  0x15   : > { %p808_p0 = por %p121_p11, %p120_p10  ;;  %s717_s27 = smov [#allocation3]  }
  0x16   : > { %s957_s25 = scalar_select %p803_p12, 1, 0 }
  0x17   : > { %s958_s26 = scalar_select %p808_p0, 1, 0 }
  0x18   : > { %s155_s28 = sshll.u32 %s717_s27, 4  ;;  %p815_p2 = pnand %p462_p1, %p785_p4  ;;  %s156_s28 = int_to_ptr.vmem [resolvable:$true] %s155_s28 }
  0x19   : > { %s548_s4 = scalar_lea.hbm %s950_s0, 256 }
  0x1a   : > { %p549_p3 = scmp.ne.s32.totalorder %s950_s0, %s548_s4  ;;  %p550_p5 = pneg %p815_p2 }
  0x1b   : > { %p555_p8 = scmp.lt.u32.totalorder %s548_s4, %s548_s4  ;;  %p557_p9 = scmp.lt.u32.totalorder %s548_s4, %s950_s0 }
  0x1c   : > { %p551_p7 = pnand %p550_p5, %p549_p3 }
  0x1d   : > { %p558_p10 = por %p557_p9, %p555_p8 }
  0x1e   : > { %p552_p4 = pneg %p551_p7 }
  0x20   : > { %p559_p11 = pnand %p558_p10, %p552_p4 }
  0x22   : > { %562 = shalt.err (!%p559_p11)
}
  0x23   : > { %s563_s12 = scalar_lea.vmem %s156_s28, 256  ;;  %s570_s17 = scalar_lea.vmem %s156_s28, 512 }
  0x24   : > { %p564_p1 = scmp.ne.s32.totalorder %s156_s28, %s563_s12  ;;  %p571_p12 = scmp.lt.s32.totalorder %s156_s28, %s156_s28 }
  0x25   : > { %p572_p6 = scmp.lt.s32.totalorder %s570_s17, %s563_s12 }
  0x26   : > { %p566_p13 = pnand %p564_p1, %p550_p5 }
  0x27   : > { %p573_p3 = por %p572_p6, %p571_p12 }
  0x28   : > { %p567_p0 = pneg %p566_p13 }
  0x2a   : > { %p574_p7 = pnand %p573_p3, %p567_p0 }
  0x2c   : > { %577 = shalt.err (!%p574_p7)
}
  0x2d   : > { %s718_s18 = smov 128   ;;  %s719_s20 = smov 8  }
  0x2e   : > { %454 = dma.hbm_to_vmem [thread:$0]  (!%p815_p2), %s950_s0, 256, %s156_s28, [#allocation4], %s718_s18, %s718_s18, %s719_s20  }
  0x2f   : > { %p430_p13 = scmp.ge.s32.totalorder %s715_s16, 1  ;;  %p187_p4 = scmp.lt.s32.totalorder %s715_s16, 3 }
  0x30   : > { %s720_s30 = smov [#allocation6]   ;;  %s578_s6 = scalar_lea.hbm %s951_s1, 256 }
  0x31   : > { %p846_p8 = pnand %p430_p13, %p187_p4  ;;  %s179_s3 = sshll.u32 %s720_s30, 4  ;;  %s180_s3 = int_to_ptr.vmem [resolvable:$true] %s179_s3 }
  0x32   : > { %p579_p6 = scmp.ne.s32.totalorder %s951_s1, %s578_s6  ;;  %p585_p9 = scmp.lt.u32.totalorder %s578_s6, %s578_s6 }
  0x33   : > { %s960_s27 = scalar_select %p846_p8, 1, 0 }
  0x34   : > { %p581_p12 = pnand %p579_p6, %p550_p5  ;;  %p587_p10 = scmp.lt.u32.totalorder %s578_s6, %s951_s1 }
  0x36   : > { %p582_p0 = pneg %p581_p12  ;;  %p588_p11 = por %p587_p10, %p585_p9 }
  0x38   : > { %p589_p1 = pnand %p588_p11, %p582_p0 }
  0x3a   : > { %592 = shalt.err (!%p589_p1)
}
  0x3b   : > { %s593_s17 = scalar_lea.vmem %s180_s3, 256  ;;  %s600_s22 = scalar_lea.vmem %s180_s3, 512 }
  0x3c   : > { %p594_p3 = scmp.ne.s32.totalorder %s180_s3, %s593_s17  ;;  %p601_p4 = scmp.lt.s32.totalorder %s180_s3, %s180_s3 }
  0x3d   : > { %p602_p8 = scmp.lt.s32.totalorder %s600_s22, %s593_s17 }
  0x3e   : > { %p596_p7 = pnand %p594_p3, %p550_p5 }
  0x3f   : > { %p603_p6 = por %p602_p8, %p601_p4 }
  0x40   : > { %p597_p13 = pneg %p596_p7 }
  0x42   : > { %p604_p12 = pnand %p603_p6, %p597_p13 }
  0x44   : > { %607 = shalt.err (!%p604_p12)
}
  0x45   : > { %457 = dma.hbm_to_vmem [thread:$0]  (!%p815_p2), %s951_s1, 256, %s180_s3, [#allocation7], %s718_s18, %s718_s18, %s719_s20  }
  0x46   : > { %p961_p0 = scmp.ne.s32.totalorder %s960_s27, 0 }
  0x47   : > { %s193_s4 = sand.u32 (!%p961_p0), 1, %s703_s13   ;;  %p962_p5 = scmp.ne.s32.totalorder (!%p961_p0), %s956_s21, 0 }
  0x48   : > { %191 = sbr.rel (%p961_p0) target bundleno = 130 (0x82), region = 28  ;;  %s431_s5 = sshll.u32 (!%p961_p0), %s193_s4, 4 }
  0x49   : > { %s194_s6 = scalar_lea.sflag (!%p961_p0), [#allocation4], %s193_s4  ;;  %s197_s7 = scalar_lea.vmem (!%p961_p0), [#allocation3], %s431_s5 }
  0x4f   : > { %673 = dma.done.wait (%p962_p5), %s194_s6, 256  }
  0x50   : > { %675 = vsyncadd (%p962_p5), %s194_s6, 4294967040  ;;  %s203_s29 = scalar_lea.sflag [#allocation7], %s193_s4  ;;  %s880_s8 = scalar_lea.vmem [#allocation6], %s431_s5 }
  0x51   : > { %677 = dma.done.wait (%p962_p5), %s203_s29, 256  }
  0x52   : > { %679 = vsyncadd (%p962_p5), %s203_s29, 4294967040  ;;  %v264_v0 = vlaneseq  ;;  %v246_v1 = vld [vmem:[%s197_s7] sm:$0xff]  ;;  %v247_v2 = vld [vmem:[%s197_s7 + $0x8] sm:$0xff]  ;;  %s436_s18 = sshll.u32 %s707_s14, 11  ;;  %s229_s21 = sand.u32 1, %s691_s10  }
  0x53   : > { %v434_v3 = vmul.f32 -1.442695, %v246_v1  ;;  %v435_v4 = vmul.f32 -1.442695, %v247_v2  ;;  %v271_v9 = vstv %s436_s18  ;;  %s433_s20 = sshll.u32 %s229_s21, 4  ;;  %v248_v19 = vld [vmem:[%s880_s8] sm:$0xff] }
  0x54   : > { %v265_v5 = vshrl.u32 %v264_v0, 7  ;;  %v268_v13 = vand.u32 127, %v264_v0  ;;  %v249_v20 = vld [vmem:[%s880_s8 + $0x8] sm:$0xff]  ;;  %s231_s27 = scalar_lea.vmem [#allocation8], %s433_s20  ;;  %s444_s28 = sshll.u32 %s707_s14, 8 }
  0x55   : > { %540 = vpow2.f32 %v434_v3  ;;  %s316_s3 = sshll.u32 %s231_s27, 4  ;;  %s896_s22 = scalar_lea.hbm %s952_s2, %s444_s28  ;;  %s891_s3 = int_to_ptr.vmem [resolvable:$true] %s316_s3 }
  0x56   : > { %542 = vpow2.f32 %v435_v4  ;;  %v266_v6 = vadd.s32 8, %v265_v5  ;;  %v269_v7 = vmul.u32 128, %v265_v5  ;;  %s898_s14 = scalar_lea.sflag [#allocation5], %s229_s21  ;;  %s608_s23 = scalar_lea.vmem %s891_s3, 256 }
  0x57   : > { %p609_p2 = scmp.ne.s32.totalorder %s891_s3, %s608_s23  ;;  %p963_p8 = scmp.ne.s32.totalorder %s957_s25, 0 }
  0x58   : > { %v270_v8 = vmul.u32 128, %v266_v6  ;;  %v272_v14 = vadd.s32 %v271_v9, %v269_v7  ;;  %s721_s30 = smov [#allocation8]  }
  0x59   : > { %p610_p9 = pnand %p609_p2, %p963_p8  ;;  %s612_s4 = sshll.u32 %s721_s30, 4  ;;  %s613_s4 = int_to_ptr.vmem [resolvable:$false] %s612_s4 }
  0x5a   : > { %v273_v16 = vadd.s32 %v271_v9, %v270_v8  ;;  %v274_v17 = vadd.s32 %v272_v14, %v268_v13  ;;  %s614_s5 = scalar_lea.vmem %s613_s4, 512  ;;  %p615_p11 = scmp.lt.s32.totalorder %s891_s3, %s613_s4 }
  0x5b   : > { %p611_p10 = pneg %p610_p9  ;;  %p616_p1 = scmp.lt.s32.totalorder %s614_s5, %s608_s23 }
  0x5c   : > { %v275_v18 = vadd.s32 %v273_v16, %v268_v13  ;;  %vm276_vm0 = vcmp.lt.s32.totalorder %v274_v17, 2048 }
  0x5d   : > { %v280_v21 = vsel %vm276_vm0, %v248_v19, 0.0  ;;  %p617_p3 = por %p616_p1, %p615_p11 }
  0x5e   : > { %vm277_vm1 = vcmp.lt.s32.totalorder %v275_v18, 2048 }
  0x5f   : > { %v541_v10 = vpop.eup %540  ;;  %v281_v23 = vsel %vm277_vm1, %v249_v20, 0.0  ;;  %p618_p7 = pnand %p617_p3, %p611_p10 }
  0x60   : > { %v543_v11 = vpop.eup %542  ;;  %v256_v12 = vadd.f32 1.0, %v541_v10 }
  0x61   : > { %v257_v15 = vadd.f32 1.0, %v543_v11 }
  0x62   : > { %544 = vrcp.f32 %v256_v12 }
  0x63   : > { %546 = vrcp.f32 %v257_v15 }
  0x6c   : > { %v545_v22 = vpop.eup %544 }
  0x6d   : > { %v547_v24 = vpop.eup %546  ;;  %v278_v25 = vsel %vm276_vm0, %v545_v22, 0.0 }
  0x6e   : > { %v279_v26 = vsel %vm277_vm1, %v547_v24, 0.0  ;;  %v282_v27 = vmul.f32 %v280_v21, %v278_v25  ;;  %v284_v28 = vadd.f32 %v280_v21, %v278_v25 }
  0x6f   : > { %v283_v29 = vmul.f32 %v281_v23, %v279_v26  ;;  %v285_v30 = vadd.f32 %v281_v23, %v279_v26 }
  0x71   : > { %v287_v31 = vadd.f32 %v283_v29, %v282_v27  ;;  %v292_v32 = vadd.f32 %v285_v30, %v284_v28 }
  0x73   : > { %300 = vst [vmem:[%s231_s27] sm:$0xff] %v287_v31  ;;  %301 = vst [vmem:[%s231_s27 + $0x8] sm:$0xff] %v292_v32 }
  0x74   : > { %621 = shalt.err (!%p618_p7)
}
  0x75   : > { %s622_s6 = scalar_lea.hbm %s896_s22, 256  ;;  %s626_s8 = scalar_lea.hbm %s952_s2, 512 }
  0x76   : > { %p623_p13 = scmp.ne.s32.totalorder %s896_s22, %s622_s6  ;;  %p627_p12 = scmp.lt.u32.totalorder %s896_s22, %s952_s2 }
  0x77   : > { %p628_p0 = scmp.lt.u32.totalorder %s626_s8, %s622_s6  ;;  %p630_p2 = scmp.lt.u32.totalorder %s622_s6, %s896_s22 }
  0x78   : > { %p624_p4 = pnand %p623_p13, %p963_p8 }
  0x79   : > { %p629_p5 = por %p628_p0, %p627_p12 }
  0x7a   : > { %p625_p6 = pneg %p624_p4 }
  0x7b   : > { %p631_p9 = por %p630_p2, %p629_p5 }
  0x7d   : > { %p632_p10 = pnand %p631_p9, %p625_p6 }
  0x7f   : > { %635 = shalt.err (!%p632_p10)
}
  0x80   : > { %s722_s20 = smov 128   ;;  %s723_s27 = smov 8  }
  0x81   : > { %449 = dma.vmem_to_hbm [thread:$0]  (%p963_p8), %s891_s3, 256, %s896_s22, %s898_s14, %s722_s20, %s722_s20, %s723_s27  }
  0x82 PF: > { %s331_s28 = sand.u32 1, %s687_s9   ;;  %p964_p11 = scmp.ne.s32.totalorder %s958_s26, 0 }
  0x83   : > { %p965_p1 = scmp.ge.s32.totalorder %s715_s16, 2  ;;  %s332_s12 = scalar_lea.sflag [#allocation5], %s331_s28 }
  0x85   : > { %p459_p3 = pnand %p965_p1, %p964_p11 }
  0x87   : > { %681 = dma.done.wait (!%p459_p3), %s332_s12, 256  }
  0x88   : > { %683 = vsyncadd (!%p459_p3), %s332_s12, 4294967040  ;;  %s21_s16 = sadd.s32 1, %s715_s16   ;;  %s966_s9 = smov %s691_s10 }
  0x89   : > { %p18_p7 = scmp.ge.s32.totalorder %s21_s16, 4   ;;  %s967_s10 = smov %s695_s11 }
  0x8a   : > { %s968_s11 = smov %s797_s24  ;;  %s969_s12 = smov %s703_s13 }
  0x8b   : > { %s940_s13 = smov 0   ;;  %s970_s14 = smov %s711_s15 }
  0x8c   : > { %s971_s15 = smov %s973_s19  ;;  %20 = sbr.rel (!%p18_p7) target bundleno = 9 (0x9), region = 95 }
  0x93   :  { %337 = vsyncpa [#allocation4], 1 }
  0x94   :  { %339 = vsyncpa [#allocation4 + $0x1], 1 }
  0x95   :  { %340 = vsyncpa [#allocation7], 1 }
  0x96   :  { %342 = vsyncpa [#allocation7 + $0x1], 1 }
  0x97   :  { %343 = vsyncpa [#allocation5], 1 }
  0x98   :  { %345 = vsyncpa [#allocation5 + $0x1], 1 }

</bundles_post_ra>
